<compile_context>
chip_gen: v5e
topology: v5e:2x2
jax: 0.10.0
libtpu: 0.0.40
codegen_flags: <defaults>
</compile_context>

<pallas_src>
import functools
import math

import jax
import jax.numpy as jnp
from jax.experimental import pallas as pl
from jax.experimental.pallas import tpu as pltpu


def _round_up(x, m):
    return ((x + m - 1) // m) * m


def _nce_softmax_kernel(idx_ref, f_s_ref, f_t_ref, m1_hbm, m2_hbm, out_ref,
                        w1_buf, w2_buf, sems,
                        m_s, l_s, m_t, l_t, pos_s, pos_t,
                        *, k_tile, k1, inv_t):
    # idx_ref : SMEM [B, K1_pad] int32 (scalar prefetch)
    # f_s_ref : VMEM [1, 1, D]  student feature row for this batch index
    # f_t_ref : VMEM [1, 1, D]  teacher feature row for this batch index
    # m1_hbm  : HBM  [n_data, D] memory_v1 (pairs with f_t)
    # m2_hbm  : HBM  [n_data, D] memory_v2 (pairs with f_s)
    # out_ref : VMEM [1, 1, 128] lane-dense per-row loss slab
    b = pl.program_id(0)
    kt = pl.program_id(1)
    nk = pl.num_programs(1)
    slot = kt % 2

    def start_gather(tile, dst_slot):
        base = tile * k_tile

        @pl.loop(0, k_tile)
        def _(j):
            row = idx_ref[b, base + j]
            pltpu.make_async_copy(m1_hbm.at[pl.ds(row, 1), :],
                                  w1_buf.at[dst_slot, pl.ds(j, 1), :],
                                  sems.at[0, dst_slot]).start()
            pltpu.make_async_copy(m2_hbm.at[pl.ds(row, 1), :],
                                  w2_buf.at[dst_slot, pl.ds(j, 1), :],
                                  sems.at[1, dst_slot]).start()

    def wait_gather(dst_slot):
        @pl.loop(0, k_tile)
        def _(j):
            # Source slice is only used for size matching; sem/dst carry the dep.
            pltpu.make_async_copy(m1_hbm.at[pl.ds(0, 1), :],
                                  w1_buf.at[dst_slot, pl.ds(j, 1), :],
                                  sems.at[0, dst_slot]).wait()
            pltpu.make_async_copy(m2_hbm.at[pl.ds(0, 1), :],
                                  w2_buf.at[dst_slot, pl.ds(j, 1), :],
                                  sems.at[1, dst_slot]).wait()

    # New batch row: reset online-logsumexp state and fetch K-tile 0 into slot 0.
    @pl.when(kt == 0)
    def _():
        m_s[...] = jnp.full_like(m_s, -1e30)
        m_t[...] = jnp.full_like(m_t, -1e30)
        l_s[...] = jnp.zeros_like(l_s)
        l_t[...] = jnp.zeros_like(l_t)
        start_gather(0, 0)

    # Double buffering: prefetch the next K tile (same batch row) into the other slot.
    @pl.when(kt + 1 < nk)
    def _():
        start_gather(kt + 1, (kt + 1) % 2)

    # Wait for the rows of the current tile (started this step for kt==0,
    # prefetched last step otherwise).
    wait_gather(slot)

    w1 = w1_buf[slot]          # [k_tile, D] memory_v1 rows (pair with f_t)
    w2 = w2_buf[slot]          # [k_tile, D] memory_v2 rows (pair with f_s)
    fs = f_s_ref[0]            # [1, D]
    ft = f_t_ref[0]            # [1, D]

    # MXU contraction over D with f32 accumulation (no wholesale f32 upcast of w).
    dn = (((1,), (1,)), ((), ()))
    logits_s = jax.lax.dot_general(
        fs, w2, dn, precision=jax.lax.Precision.HIGHEST,
        preferred_element_type=jnp.float32) * inv_t          # [1, k_tile]
    logits_t = jax.lax.dot_general(
        ft, w1, dn, precision=jax.lax.Precision.HIGHEST,
        preferred_element_type=jnp.float32) * inv_t          # [1, k_tile]

    # Mask padded K columns so they contribute nothing to the logsumexp.
    col = kt * k_tile + jax.lax.broadcasted_iota(jnp.int32, (1, k_tile), 1)
    valid = col < k1
    neg = jnp.float32(-1e30)
    logits_s = jnp.where(valid, logits_s, neg)
    logits_t = jnp.where(valid, logits_t, neg)

    # Positive sample sits at global column 0 (first column of K-tile 0).
    @pl.when(kt == 0)
    def _():
        pos_s[...] = logits_s[:, 0:1]
        pos_t[...] = logits_t[:, 0:1]

    def online_update(logits, m_ref, l_ref):
        m_prev = m_ref[...]
        m_new = jnp.maximum(m_prev, jnp.max(logits, axis=-1, keepdims=True))
        l_ref[...] = (l_ref[...] * jnp.exp(m_prev - m_new)
                      + jnp.sum(jnp.exp(logits - m_new), axis=-1, keepdims=True))
        m_ref[...] = m_new

    online_update(logits_s, m_s, l_s)
    online_update(logits_t, m_t, l_t)

    # Finalize this batch row: CE(target=0) for both views, lane-dense store.
    @pl.when(kt == nk - 1)
    def _():
        loss_s = m_s[...] + jnp.log(l_s[...]) - pos_s[...]
        loss_t = m_t[...] + jnp.log(l_t[...]) - pos_t[...]
        row_loss = (loss_s + loss_t).reshape(1, 1, 1)
        out_ref[...] = jnp.broadcast_to(row_loss, out_ref.shape).astype(jnp.float32)


def nce_softmax_loss(f_s, f_t, idx, memory_v1, memory_v2, nce_t, *, k_tile=None):
    """Forward pass of NCESoftmaxLoss. Returns a scalar float32 loss."""
    bsz, feat_dim = f_s.shape
    k1 = idx.shape[1]                      # K + 1 samples per row (positive at col 0)

    if k_tile is None:
        # Keep the double-buffered gather scratch (2 views x 2 slots x k_tile x D)
        # small enough for v7x's 64 MiB VMEM as well as v5e/v6e.
        k_tile = min(128, _round_up(k1, 8))
    k1_pad = _round_up(k1, k_tile)
    nk = k1_pad // k_tile

    # Pad idx with a valid row index (0); the padded logits are masked in-kernel.
    idx_pad = jnp.zeros((bsz, k1_pad), dtype=jnp.int32).at[:, :k1].set(
        idx.astype(jnp.int32))

    # Singleton middle axis keeps the (sublane, lane) block dims equal to the
    # full array dims, satisfying the TPU block-shape tiling rules.
    f_s3 = f_s.reshape(bsz, 1, feat_dim)
    f_t3 = f_t.reshape(bsz, 1, feat_dim)

    kernel = functools.partial(_nce_softmax_kernel, k_tile=k_tile, k1=k1,
                               inv_t=float(1.0 / nce_t))

    mem_itemsize = jnp.dtype(memory_v1.dtype).itemsize
    feat_itemsize = jnp.dtype(f_s.dtype).itemsize
    cost = pl.CostEstimate(
        flops=2 * 2 * bsz * k1_pad * feat_dim,
        transcendentals=2 * bsz * k1_pad,
        bytes_accessed=(2 * bsz * k1_pad * feat_dim * mem_itemsize
                        + 2 * bsz * feat_dim * feat_itemsize
                        + bsz * 128 * 4),
    )

    out = pl.pallas_call(
        kernel,
        out_shape=jax.ShapeDtypeStruct((bsz, 1, 128), jnp.float32),
        grid_spec=pltpu.PrefetchScalarGridSpec(
            num_scalar_prefetch=1,
            grid=(bsz, nk),
            in_specs=[
                pl.BlockSpec((1, 1, feat_dim), lambda b, kt, idx_ref: (b, 0, 0)),
                pl.BlockSpec((1, 1, feat_dim), lambda b, kt, idx_ref: (b, 0, 0)),
                pl.BlockSpec(memory_space=pl.ANY),   # memory_v1 stays in HBM
                pl.BlockSpec(memory_space=pl.ANY),   # memory_v2 stays in HBM
            ],
            out_specs=pl.BlockSpec((1, 1, 128), lambda b, kt, idx_ref: (b, 0, 0)),
            scratch_shapes=[
                pltpu.VMEM((2, k_tile, feat_dim), memory_v1.dtype),  # w1 double buffer
                pltpu.VMEM((2, k_tile, feat_dim), memory_v2.dtype),  # w2 double buffer
                pltpu.SemaphoreType.DMA((2, 2)),                     # [view, slot]
                pltpu.VMEM((1, 1), jnp.float32),  # m_s (running max, student)
                pltpu.VMEM((1, 1), jnp.float32),  # l_s (running sum-exp, student)
                pltpu.VMEM((1, 1), jnp.float32),  # m_t (running max, teacher)
                pltpu.VMEM((1, 1), jnp.float32),  # l_t (running sum-exp, teacher)
                pltpu.VMEM((1, 1), jnp.float32),  # pos_s (positive logit, student)
                pltpu.VMEM((1, 1), jnp.float32),  # pos_t (positive logit, teacher)
            ],
        ),
        compiler_params=pltpu.CompilerParams(
            dimension_semantics=("parallel", "arbitrary"),
            vmem_limit_bytes=32 * 1024 * 1024,
        ),
        cost_estimate=cost,
    )(idx_pad, f_s3, f_t3, memory_v1, memory_v2)

    return jnp.mean(out[:, 0, 0])


if __name__ == "__main__":
    # Hyperparameters implied by the module's __init__ (small synthetic sizes).
    bsz = 2          # batch size
    feat_dim = 128   # opt.feat_dim (CRD default), lane-aligned
    n_data = 64      # memory bank size
    nce_k = 8        # opt.nce_k  -> K+1 = 9 logits per sample
    nce_t = 0.07     # opt.nce_t
    # nce_m (momentum) only affects the omitted memory-bank update.

    key = jax.random.PRNGKey(0)
    k_fs, k_ft, k_idx, k_m1, k_m2 = jax.random.split(key, 5)

    f_s = jax.random.normal(k_fs, (bsz, feat_dim), dtype=jnp.float32)
    f_t = jax.random.normal(k_ft, (bsz, feat_dim), dtype=jnp.float32)

    # Memory-bank init matching the PyTorch buffer init:
    #   uniform in [-stdv, stdv], stdv = 1/sqrt(feat_dim/3)
    stdv = 1.0 / math.sqrt(feat_dim / 3.0)
    memory_v1 = jax.random.uniform(k_m1, (n_data, feat_dim),
                                   minval=-stdv, maxval=stdv, dtype=jnp.float32)
    memory_v2 = jax.random.uniform(k_m2, (n_data, feat_dim),
                                   minval=-stdv, maxval=stdv, dtype=jnp.float32)

    # idx: [bsz, K+1]; column 0 holds the positive index y.
    y = jnp.arange(bsz, dtype=jnp.int32)
    neg = jax.random.randint(k_idx, (bsz, nce_k + 1), 0, n_data, dtype=jnp.int32)
    idx = neg.at[:, 0].set(y)

    # k_tile=8 -> two K tiles, exercising the online logsumexp and the
    # double-buffered in-kernel gather.
    loss = nce_softmax_loss(f_s, f_t, idx, memory_v1, memory_v2, nce_t, k_tile=8)
    jax.block_until_ready(loss)

    # Pure-JAX reference check (same math, outside Pallas).
    w1 = memory_v1[idx]           # [B, K+1, D]
    w2 = memory_v2[idx]
    lo_s = jnp.einsum("bkd,bd->bk", w2, f_s,
                      precision=jax.lax.Precision.HIGHEST) / nce_t
    lo_t = jnp.einsum("bkd,bd->bk", w1, f_t,
                      precision=jax.lax.Precision.HIGHEST) / nce_t
    ce = lambda lo: jnp.mean(jax.nn.logsumexp(lo, axis=-1) - lo[:, 0])
    ref = ce(lo_s) + ce(lo_t)
    assert jnp.allclose(loss, ref, rtol=1e-4, atol=1e-4), (loss, ref)

    print("KERNEL_OK")
</pallas_src>

<mosaic_0001>
module attributes {stable_mosaic.version = 11 : i64} {
  func.func @_nce_softmax_kernel(%arg0: i32, %arg1: i32, %arg2: memref<2x16xi32, #tpu.memory_space<smem>>, %arg3: memref<1x1x128xf32, #tpu.memory_space<vmem>>, %arg4: memref<1x1x128xf32, #tpu.memory_space<vmem>>, %arg5: memref<64x128xf32, #tpu.memory_space<any>>, %arg6: memref<64x128xf32, #tpu.memory_space<any>>, %arg7: memref<1x1x128xf32, #tpu.memory_space<vmem>>, %arg8: memref<2x8x128xf32, #tpu.memory_space<vmem>>, %arg9: memref<2x8x128xf32, #tpu.memory_space<vmem>>, %arg10: memref<2x2x!tpu.dma_semaphore, #tpu.memory_space<semaphore_mem>>, %arg11: memref<1x1xf32, #tpu.memory_space<vmem>>, %arg12: memref<1x1xf32, #tpu.memory_space<vmem>>, %arg13: memref<1x1xf32, #tpu.memory_space<vmem>>, %arg14: memref<1x1xf32, #tpu.memory_space<vmem>>, %arg15: memref<1x1xf32, #tpu.memory_space<vmem>>, %arg16: memref<1x1xf32, #tpu.memory_space<vmem>>) attributes {dimension_semantics = [#tpu.dimension_semantics<parallel>, #tpu.dimension_semantics<arbitrary>], iteration_bounds = array<i64: 2, 2>, scalar_prefetch = 1 : i64, scratch_operands = 9 : i64, tpu.core_type = #tpu.core_type<tc>, window_params = [{transform_indices = @transform_0, window_bounds = array<i64: 1, 1, 128>}, {transform_indices = @transform_1, window_bounds = array<i64: 1, 1, 128>}, {}, {}, {transform_indices = @transform_4, window_bounds = array<i64: 1, 1, 128>}]} {
    %c2_i32 = arith.constant 2 : i32
    %c0_i32 = arith.constant 0 : i32
    %0 = arith.cmpi eq, %c2_i32, %c0_i32 : i32
    %c1_i32 = arith.constant 1 : i32
    %1 = arith.select %0, %c1_i32, %c2_i32 : i32
    %2 = arith.remsi %arg1, %1 : i32
    %c0_i32_0 = arith.constant 0 : i32
    %3 = arith.cmpi ne, %2, %c0_i32_0 : i32
    %c0_i32_1 = arith.constant 0 : i32
    %4 = arith.cmpi slt, %2, %c0_i32_1 : i32
    %c0_i32_2 = arith.constant 0 : i32
    %5 = arith.cmpi slt, %1, %c0_i32_2 : i32
    %6 = arith.xori %4, %5 : i1
    %7 = arith.andi %6, %3 : i1
    %8 = arith.addi %2, %1 : i32
    %9 = arith.select %7, %8, %2 : i32
    %c0_i32_3 = arith.constant 0 : i32
    %10 = arith.cmpi eq, %arg1, %c0_i32_3 : i32
    %11 = arith.extui %10 : i1 to i32
    %c0_i32_4 = arith.constant 0 : i32
    %12 = arith.cmpi ne, %11, %c0_i32_4 : i32
    scf.if %12 {
      %cst_50 = arith.constant -1.000000e+30 : f32
      %82 = vector.broadcast %cst_50 : f32 to vector<1x1xf32>
      %c0_51 = arith.constant 0 : index
      %c0_52 = arith.constant 0 : index
      %83 = vector.load %arg11[%c0_51, %c0_52] : memref<1x1xf32, #tpu.memory_space<vmem>>, vector<1x1xf32>
      tpu.vector_store %arg11[%c0_51, %c0_52], %82 {strides = array<i32>} : memref<1x1xf32, #tpu.memory_space<vmem>>, vector<1x1xf32>,
      %cst_53 = arith.constant -1.000000e+30 : f32
      %84 = vector.broadcast %cst_53 : f32 to vector<1x1xf32>
      %c0_54 = arith.constant 0 : index
      %c0_55 = arith.constant 0 : index
      %85 = vector.load %arg13[%c0_54, %c0_55] : memref<1x1xf32, #tpu.memory_space<vmem>>, vector<1x1xf32>
      tpu.vector_store %arg13[%c0_54, %c0_55], %84 {strides = array<i32>} : memref<1x1xf32, #tpu.memory_space<vmem>>, vector<1x1xf32>,
      %cst_56 = arith.constant 0.000000e+00 : f32
      %86 = vector.broadcast %cst_56 : f32 to vector<1x1xf32>
      %c0_57 = arith.constant 0 : index
      %c0_58 = arith.constant 0 : index
      %87 = vector.load %arg12[%c0_57, %c0_58] : memref<1x1xf32, #tpu.memory_space<vmem>>, vector<1x1xf32>
      tpu.vector_store %arg12[%c0_57, %c0_58], %86 {strides = array<i32>} : memref<1x1xf32, #tpu.memory_space<vmem>>, vector<1x1xf32>,
      %cst_59 = arith.constant 0.000000e+00 : f32
      %88 = vector.broadcast %cst_59 : f32 to vector<1x1xf32>
      %c0_60 = arith.constant 0 : index
      %c0_61 = arith.constant 0 : index
      %89 = vector.load %arg14[%c0_60, %c0_61] : memref<1x1xf32, #tpu.memory_space<vmem>>, vector<1x1xf32>
      tpu.vector_store %arg14[%c0_60, %c0_61], %88 {strides = array<i32>} : memref<1x1xf32, #tpu.memory_space<vmem>>, vector<1x1xf32>,
      %c0_i32_62 = arith.constant 0 : i32
      %c8_i32_63 = arith.constant 8 : i32
      %90 = arith.addi %c0_i32_62, %c8_i32_63 : i32
      %c1_i32_64 = arith.constant 1 : i32
      scf.for %arg17 = %c0_i32_62 to %90 step %c1_i32_64  : i32 {
        %c1_i32_66 = arith.constant 1 : i32
        %91 = arith.muli %arg17, %c1_i32_66 : i32
        %c0_i32_67 = arith.constant 0 : i32
        %92 = arith.addi %c0_i32_67, %91 : i32
        %c0_i32_68 = arith.constant 0 : i32
        %93 = arith.addi %c0_i32_68, %92 : i32
        %94 = arith.index_cast %arg0 : i32 to index
        %95 = arith.index_cast %93 : i32 to index
        %96 = memref.load %arg2[%94, %95] : memref<2x16xi32, #tpu.memory_space<smem>>
        %c0_i32_69 = arith.constant 0 : i32
        %c0_i32_70 = arith.constant 0 : i32
        %c0_i32_71 = arith.constant 0 : i32
        %c0_i32_72 = arith.constant 0 : i32
        %97 = tpu.memref_slice %arg5[%96, %c0_i32_72] : memref<64x128xf32, #tpu.memory_space<any>> -> memref<1x128xf32, #tpu.memory_space<any>>
        %c0_i32_73 = arith.constant 0 : i32
        %98 = tpu.memref_slice %arg8[%c0_i32_69, %92, %c0_i32_73] : memref<2x8x128xf32, #tpu.memory_space<vmem>> -> memref<1x1x128xf32, #tpu.memory_space<vmem>>
        %99 = tpu.memref_squeeze %98 : memref<1x1x128xf32, #tpu.memory_space<vmem>> -> memref<1x128xf32, #tpu.memory_space<vmem>>
        %100 = tpu.memref_slice %arg10[%c0_i32_70, %c0_i32_71] : memref<2x2x!tpu.dma_semaphore, #tpu.memory_space<semaphore_mem>> -> memref<1x1x!tpu.dma_semaphore, #tpu.memory_space<semaphore_mem>>
        %101 = tpu.memref_squeeze %100 : memref<1x1x!tpu.dma_semaphore, #tpu.memory_space<semaphore_mem>> -> memref<!tpu.dma_semaphore, #tpu.memory_space<semaphore_mem>>
        tpu.enqueue_dma source(%97 : memref<1x128xf32, #tpu.memory_space<any>>) target(%99 : memref<1x128xf32, #tpu.memory_space<vmem>>) target_semaphore(%101 : memref<!tpu.dma_semaphore, #tpu.memory_space<semaphore_mem>>)
        %c0_i32_74 = arith.constant 0 : i32
        %c1_i32_75 = arith.constant 1 : i32
        %c0_i32_76 = arith.constant 0 : i32
        %c0_i32_77 = arith.constant 0 : i32
        %102 = tpu.memref_slice %arg6[%96, %c0_i32_77] : memref<64x128xf32, #tpu.memory_space<any>> -> memref<1x128xf32, #tpu.memory_space<any>>
        %c0_i32_78 = arith.constant 0 : i32
        %103 = tpu.memref_slice %arg9[%c0_i32_74, %92, %c0_i32_78] : memref<2x8x128xf32, #tpu.memory_space<vmem>> -> memref<1x1x128xf32, #tpu.memory_space<vmem>>
        %104 = tpu.memref_squeeze %103 : memref<1x1x128xf32, #tpu.memory_space<vmem>> -> memref<1x128xf32, #tpu.memory_space<vmem>>
        %105 = tpu.memref_slice %arg10[%c1_i32_75, %c0_i32_76] : memref<2x2x!tpu.dma_semaphore, #tpu.memory_space<semaphore_mem>> -> memref<1x1x!tpu.dma_semaphore, #tpu.memory_space<semaphore_mem>>
        %106 = tpu.memref_squeeze %105 : memref<1x1x!tpu.dma_semaphore, #tpu.memory_space<semaphore_mem>> -> memref<!tpu.dma_semaphore, #tpu.memory_space<semaphore_mem>>
        tpu.enqueue_dma source(%102 : memref<1x128xf32, #tpu.memory_space<any>>) target(%104 : memref<1x128xf32, #tpu.memory_space<vmem>>) target_semaphore(%106 : memref<!tpu.dma_semaphore, #tpu.memory_space<semaphore_mem>>)
      }
      %c8_i32_65 = arith.constant 8 : i32
    } else {
    }
    %c1_i32_5 = arith.constant 1 : i32
    %13 = arith.addi %arg1, %c1_i32_5 : i32
    %c2_i32_6 = arith.constant 2 : i32
    %14 = arith.cmpi slt, %13, %c2_i32_6 : i32
    %15 = arith.extui %14 : i1 to i32
    %c0_i32_7 = arith.constant 0 : i32
    %16 = arith.cmpi ne, %15, %c0_i32_7 : i32
    scf.if %16 {
      %c1_i32_50 = arith.constant 1 : i32
      %82 = arith.addi %arg1, %c1_i32_50 : i32
      %c1_i32_51 = arith.constant 1 : i32
      %83 = arith.addi %arg1, %c1_i32_51 : i32
      %c2_i32_52 = arith.constant 2 : i32
      %c0_i32_53 = arith.constant 0 : i32
      %84 = arith.cmpi eq, %c2_i32_52, %c0_i32_53 : i32
      %c1_i32_54 = arith.constant 1 : i32
      %85 = arith.select %84, %c1_i32_54, %c2_i32_52 : i32
      %86 = arith.remsi %83, %85 : i32
      %c0_i32_55 = arith.constant 0 : i32
      %87 = arith.cmpi ne, %86, %c0_i32_55 : i32
      %c0_i32_56 = arith.constant 0 : i32
      %88 = arith.cmpi slt, %86, %c0_i32_56 : i32
      %c0_i32_57 = arith.constant 0 : i32
      %89 = arith.cmpi slt, %85, %c0_i32_57 : i32
      %90 = arith.xori %88, %89 : i1
      %91 = arith.andi %90, %87 : i1
      %92 = arith.addi %86, %85 : i32
      %93 = arith.select %91, %92, %86 : i32
      %c8_i32_58 = arith.constant 8 : i32
      %94 = arith.muli %82, %c8_i32_58 : i32
      %c0_i32_59 = arith.constant 0 : i32
      %c8_i32_60 = arith.constant 8 : i32
      %95 = arith.addi %c0_i32_59, %c8_i32_60 : i32
      %c1_i32_61 = arith.constant 1 : i32
      scf.for %arg17 = %c0_i32_59 to %95 step %c1_i32_61  : i32 {
        %c1_i32_63 = arith.constant 1 : i32
        %96 = arith.muli %arg17, %c1_i32_63 : i32
        %c0_i32_64 = arith.constant 0 : i32
        %97 = arith.addi %c0_i32_64, %96 : i32
        %98 = arith.addi %94, %97 : i32
        %99 = arith.index_cast %arg0 : i32 to index
        %100 = arith.index_cast %98 : i32 to index
        %101 = memref.load %arg2[%99, %100] : memref<2x16xi32, #tpu.memory_space<smem>>
        %c0_i32_65 = arith.constant 0 : i32
        %c0_i32_66 = arith.constant 0 : i32
        %102 = tpu.memref_slice %arg5[%101, %c0_i32_66] : memref<64x128xf32, #tpu.memory_space<any>> -> memref<1x128xf32, #tpu.memory_space<any>>
        %c0_i32_67 = arith.constant 0 : i32
        %103 = tpu.memref_slice %arg8[%93, %97, %c0_i32_67] : memref<2x8x128xf32, #tpu.memory_space<vmem>> -> memref<1x1x128xf32, #tpu.memory_space<vmem>>
        %104 = tpu.memref_squeeze %103 : memref<1x1x128xf32, #tpu.memory_space<vmem>> -> memref<1x128xf32, #tpu.memory_space<vmem>>
        %105 = tpu.memref_slice %arg10[%c0_i32_65, %93] : memref<2x2x!tpu.dma_semaphore, #tpu.memory_space<semaphore_mem>> -> memref<1x1x!tpu.dma_semaphore, #tpu.memory_space<semaphore_mem>>
        %106 = tpu.memref_squeeze %105 : memref<1x1x!tpu.dma_semaphore, #tpu.memory_space<semaphore_mem>> -> memref<!tpu.dma_semaphore, #tpu.memory_space<semaphore_mem>>
        tpu.enqueue_dma source(%102 : memref<1x128xf32, #tpu.memory_space<any>>) target(%104 : memref<1x128xf32, #tpu.memory_space<vmem>>) target_semaphore(%106 : memref<!tpu.dma_semaphore, #tpu.memory_space<semaphore_mem>>)
        %c1_i32_68 = arith.constant 1 : i32
        %c0_i32_69 = arith.constant 0 : i32
        %107 = tpu.memref_slice %arg6[%101, %c0_i32_69] : memref<64x128xf32, #tpu.memory_space<any>> -> memref<1x128xf32, #tpu.memory_space<any>>
        %c0_i32_70 = arith.constant 0 : i32
        %108 = tpu.memref_slice %arg9[%93, %97, %c0_i32_70] : memref<2x8x128xf32, #tpu.memory_space<vmem>> -> memref<1x1x128xf32, #tpu.memory_space<vmem>>
        %109 = tpu.memref_squeeze %108 : memref<1x1x128xf32, #tpu.memory_space<vmem>> -> memref<1x128xf32, #tpu.memory_space<vmem>>
        %110 = tpu.memref_slice %arg10[%c1_i32_68, %93] : memref<2x2x!tpu.dma_semaphore, #tpu.memory_space<semaphore_mem>> -> memref<1x1x!tpu.dma_semaphore, #tpu.memory_space<semaphore_mem>>
        %111 = tpu.memref_squeeze %110 : memref<1x1x!tpu.dma_semaphore, #tpu.memory_space<semaphore_mem>> -> memref<!tpu.dma_semaphore, #tpu.memory_space<semaphore_mem>>
        tpu.enqueue_dma source(%107 : memref<1x128xf32, #tpu.memory_space<any>>) target(%109 : memref<1x128xf32, #tpu.memory_space<vmem>>) target_semaphore(%111 : memref<!tpu.dma_semaphore, #tpu.memory_space<semaphore_mem>>)
      }
      %c8_i32_62 = arith.constant 8 : i32
    } else {
    }
    %c0_i32_8 = arith.constant 0 : i32
    %c8_i32 = arith.constant 8 : i32
    %17 = arith.addi %c0_i32_8, %c8_i32 : i32
    %c1_i32_9 = arith.constant 1 : i32
    scf.for %arg17 = %c0_i32_8 to %17 step %c1_i32_9  : i32 {
      %c1_i32_50 = arith.constant 1 : i32
      %82 = arith.muli %arg17, %c1_i32_50 : i32
      %c0_i32_51 = arith.constant 0 : i32
      %83 = arith.addi %c0_i32_51, %82 : i32
      %c0_i32_52 = arith.constant 0 : i32
      %c0_i32_53 = arith.constant 0 : i32
      %c0_i32_54 = arith.constant 0 : i32
      %84 = tpu.memref_slice %arg5[%c0_i32_53, %c0_i32_54] : memref<64x128xf32, #tpu.memory_space<any>> -> memref<1x128xf32, #tpu.memory_space<any>>
      %c0_i32_55 = arith.constant 0 : i32
      %85 = tpu.memref_slice %arg8[%9, %83, %c0_i32_55] : memref<2x8x128xf32, #tpu.memory_space<vmem>> -> memref<1x1x128xf32, #tpu.memory_space<vmem>>
      %86 = tpu.memref_squeeze %85 : memref<1x1x128xf32, #tpu.memory_space<vmem>> -> memref<1x128xf32, #tpu.memory_space<vmem>>
      %87 = tpu.memref_slice %arg10[%c0_i32_52, %9] : memref<2x2x!tpu.dma_semaphore, #tpu.memory_space<semaphore_mem>> -> memref<1x1x!tpu.dma_semaphore, #tpu.memory_space<semaphore_mem>>
      %88 = tpu.memref_squeeze %87 : memref<1x1x!tpu.dma_semaphore, #tpu.memory_space<semaphore_mem>> -> memref<!tpu.dma_semaphore, #tpu.memory_space<semaphore_mem>>
      tpu.wait_dma2 semaphore(%88 : memref<!tpu.dma_semaphore, #tpu.memory_space<semaphore_mem>>) src(%84 : memref<1x128xf32, #tpu.memory_space<any>>) dst(%86 : memref<1x128xf32, #tpu.memory_space<vmem>>)
      %c1_i32_56 = arith.constant 1 : i32
      %c0_i32_57 = arith.constant 0 : i32
      %c0_i32_58 = arith.constant 0 : i32
      %89 = tpu.memref_slice %arg6[%c0_i32_57, %c0_i32_58] : memref<64x128xf32, #tpu.memory_space<any>> -> memref<1x128xf32, #tpu.memory_space<any>>
      %c0_i32_59 = arith.constant 0 : i32
      %90 = tpu.memref_slice %arg9[%9, %83, %c0_i32_59] : memref<2x8x128xf32, #tpu.memory_space<vmem>> -> memref<1x1x128xf32, #tpu.memory_space<vmem>>
      %91 = tpu.memref_squeeze %90 : memref<1x1x128xf32, #tpu.memory_space<vmem>> -> memref<1x128xf32, #tpu.memory_space<vmem>>
      %92 = tpu.memref_slice %arg10[%c1_i32_56, %9] : memref<2x2x!tpu.dma_semaphore, #tpu.memory_space<semaphore_mem>> -> memref<1x1x!tpu.dma_semaphore, #tpu.memory_space<semaphore_mem>>
      %93 = tpu.memref_squeeze %92 : memref<1x1x!tpu.dma_semaphore, #tpu.memory_space<semaphore_mem>> -> memref<!tpu.dma_semaphore, #tpu.memory_space<semaphore_mem>>
      tpu.wait_dma2 semaphore(%93 : memref<!tpu.dma_semaphore, #tpu.memory_space<semaphore_mem>>) src(%89 : memref<1x128xf32, #tpu.memory_space<any>>) dst(%91 : memref<1x128xf32, #tpu.memory_space<vmem>>)
    }
    %c8_i32_10 = arith.constant 8 : i32
    %18 = arith.index_cast %9 : i32 to index
    %c0 = arith.constant 0 : index
    %c0_11 = arith.constant 0 : index
    %19 = vector.load %arg8[%18, %c0, %c0_11] : memref<2x8x128xf32, #tpu.memory_space<vmem>>, vector<1x8x128xf32>
    %20 = vector.shape_cast %19 : vector<1x8x128xf32> to vector<8x128xf32>
    %21 = arith.index_cast %9 : i32 to index
    %c0_12 = arith.constant 0 : index
    %c0_13 = arith.constant 0 : index
    %22 = vector.load %arg9[%21, %c0_12, %c0_13] : memref<2x8x128xf32, #tpu.memory_space<vmem>>, vector<1x8x128xf32>
    %23 = vector.shape_cast %22 : vector<1x8x128xf32> to vector<8x128xf32>
    %c0_14 = arith.constant 0 : index
    %c0_15 = arith.constant 0 : index
    %c0_16 = arith.constant 0 : index
    %24 = vector.load %arg3[%c0_14, %c0_15, %c0_16] : memref<1x1x128xf32, #tpu.memory_space<vmem>>, vector<1x1x128xf32>
    %25 = vector.shape_cast %24 : vector<1x1x128xf32> to vector<1x128xf32>
    %c0_17 = arith.constant 0 : index
    %c0_18 = arith.constant 0 : index
    %c0_19 = arith.constant 0 : index
    %26 = vector.load %arg4[%c0_17, %c0_18, %c0_19] : memref<1x1x128xf32, #tpu.memory_space<vmem>>, vector<1x1x128xf32>
    %27 = vector.shape_cast %26 : vector<1x1x128xf32> to vector<1x128xf32>
    %cst = arith.constant dense<0.000000e+00> : vector<1x8xf32>
    %28 = tpu.matmul %25, %23, %cst {dimension_numbers = #tpu.dot_dimension_numbers<[1], [1], [0], [0], [0, 0, 1, 0], [], []>, precision = #tpu.contract_precision<fp32>} : vector<1x128xf32>, vector<8x128xf32>, vector<1x8xf32> -> vector<1x8xf32>
    %cst_20 = arith.constant 14.2857141 : f32
    %29 = vector.broadcast %cst_20 : f32 to vector<1x8xf32>
    %30 = arith.mulf %28, %29 : vector<1x8xf32>
    %cst_21 = arith.constant dense<0.000000e+00> : vector<1x8xf32>
    %31 = tpu.matmul %27, %20, %cst_21 {dimension_numbers = #tpu.dot_dimension_numbers<[1], [1], [0], [0], [0, 0, 1, 0], [], []>, precision = #tpu.contract_precision<fp32>} : vector<1x128xf32>, vector<8x128xf32>, vector<1x8xf32> -> vector<1x8xf32>
    %cst_22 = arith.constant 14.2857141 : f32
    %32 = vector.broadcast %cst_22 : f32 to vector<1x8xf32>
    %33 = arith.mulf %31, %32 : vector<1x8xf32>
    %c8_i32_23 = arith.constant 8 : i32
    %34 = arith.muli %arg1, %c8_i32_23 : i32
    %35 = tpu.iota {dimensions = array<i32: 1>} : vector<1x8xi32>
    %36 = vector.broadcast %34 : i32 to vector<1x8xi32>
    %37 = arith.addi %36, %35 : vector<1x8xi32>
    %c9_i32 = arith.constant 9 : i32
    %38 = vector.broadcast %c9_i32 : i32 to vector<1x8xi32>
    %39 = arith.cmpi slt, %37, %38 : vector<1x8xi32>
    %cst_24 = arith.constant -1.000000e+30 : f32
    %40 = vector.broadcast %cst_24 : f32 to vector<1x8xf32>
    %41 = arith.select %39, %30, %40 : vector<1x8xi1>, vector<1x8xf32>
    %cst_25 = arith.constant -1.000000e+30 : f32
    %42 = vector.broadcast %cst_25 : f32 to vector<1x8xf32>
    %43 = arith.select %39, %33, %42 : vector<1x8xi1>, vector<1x8xf32>
    %c0_i32_26 = arith.constant 0 : i32
    %44 = arith.cmpi eq, %arg1, %c0_i32_26 : i32
    %45 = arith.extui %44 : i1 to i32
    %c0_i32_27 = arith.constant 0 : i32
    %46 = arith.cmpi ne, %45, %c0_i32_27 : i32
    scf.if %46 {
      %82 = vector.extract_strided_slice %41 {offsets = [0, 0], sizes = [1, 1], strides = [1, 1]} : vector<1x8xf32> to vector<1x1xf32>
      %c0_50 = arith.constant 0 : index
      %c0_51 = arith.constant 0 : index
      %83 = vector.load %arg15[%c0_50, %c0_51] : memref<1x1xf32, #tpu.memory_space<vmem>>, vector<1x1xf32>
      tpu.vector_store %arg15[%c0_50, %c0_51], %82 {strides = array<i32>} : memref<1x1xf32, #tpu.memory_space<vmem>>, vector<1x1xf32>,
      %84 = vector.extract_strided_slice %43 {offsets = [0, 0], sizes = [1, 1], strides = [1, 1]} : vector<1x8xf32> to vector<1x1xf32>
      %c0_52 = arith.constant 0 : index
      %c0_53 = arith.constant 0 : index
      %85 = vector.load %arg16[%c0_52, %c0_53] : memref<1x1xf32, #tpu.memory_space<vmem>>, vector<1x1xf32>
      tpu.vector_store %arg16[%c0_52, %c0_53], %84 {strides = array<i32>} : memref<1x1xf32, #tpu.memory_space<vmem>>, vector<1x1xf32>,
    } else {
    }
    %c0_28 = arith.constant 0 : index
    %c0_29 = arith.constant 0 : index
    %47 = vector.load %arg11[%c0_28, %c0_29] : memref<1x1xf32, #tpu.memory_space<vmem>>, vector<1x1xf32>
    %cst_30 = arith.constant dense<0xFF800000> : vector<1xf32>
    %48 = vector.multi_reduction <maximumf>, %41, %cst_30 [1] : vector<1x8xf32> to vector<1xf32>
    %49 = vector.shape_cast %48 : vector<1xf32> to vector<1x1xf32>
    %50 = arith.maximumf %47, %49 : vector<1x1xf32>
    %c0_31 = arith.constant 0 : index
    %c0_32 = arith.constant 0 : index
    %51 = vector.load %arg12[%c0_31, %c0_32] : memref<1x1xf32, #tpu.memory_space<vmem>>, vector<1x1xf32>
    %52 = arith.subf %47, %50 : vector<1x1xf32>
    %53 = math.exp %52 : vector<1x1xf32>
    %54 = arith.mulf %51, %53 : vector<1x1xf32>
    %55 = vector.broadcast %50 : vector<1x1xf32> to vector<1x8xf32>
    %56 = arith.subf %41, %55 : vector<1x8xf32>
    %57 = math.exp %56 : vector<1x8xf32>
    %cst_33 = arith.constant dense<0.000000e+00> : vector<1xf32>
    %58 = vector.multi_reduction <add>, %57, %cst_33 [1] : vector<1x8xf32> to vector<1xf32>
    %59 = vector.shape_cast %58 : vector<1xf32> to vector<1x1xf32>
    %60 = arith.addf %54, %59 : vector<1x1xf32>
    %c0_34 = arith.constant 0 : index
    %c0_35 = arith.constant 0 : index
    %61 = vector.load %arg12[%c0_34, %c0_35] : memref<1x1xf32, #tpu.memory_space<vmem>>, vector<1x1xf32>
    tpu.vector_store %arg12[%c0_34, %c0_35], %60 {strides = array<i32>} : memref<1x1xf32, #tpu.memory_space<vmem>>, vector<1x1xf32>,
    %c0_36 = arith.constant 0 : index
    %c0_37 = arith.constant 0 : index
    %62 = vector.load %arg11[%c0_36, %c0_37] : memref<1x1xf32, #tpu.memory_space<vmem>>, vector<1x1xf32>
    tpu.vector_store %arg11[%c0_36, %c0_37], %50 {strides = array<i32>} : memref<1x1xf32, #tpu.memory_space<vmem>>, vector<1x1xf32>,
    %c0_38 = arith.constant 0 : index
    %c0_39 = arith.constant 0 : index
    %63 = vector.load %arg13[%c0_38, %c0_39] : memref<1x1xf32, #tpu.memory_space<vmem>>, vector<1x1xf32>
    %cst_40 = arith.constant dense<0xFF800000> : vector<1xf32>
    %64 = vector.multi_reduction <maximumf>, %43, %cst_40 [1] : vector<1x8xf32> to vector<1xf32>
    %65 = vector.shape_cast %64 : vector<1xf32> to vector<1x1xf32>
    %66 = arith.maximumf %63, %65 : vector<1x1xf32>
    %c0_41 = arith.constant 0 : index
    %c0_42 = arith.constant 0 : index
    %67 = vector.load %arg14[%c0_41, %c0_42] : memref<1x1xf32, #tpu.memory_space<vmem>>, vector<1x1xf32>
    %68 = arith.subf %63, %66 : vector<1x1xf32>
    %69 = math.exp %68 : vector<1x1xf32>
    %70 = arith.mulf %67, %69 : vector<1x1xf32>
    %71 = vector.broadcast %66 : vector<1x1xf32> to vector<1x8xf32>
    %72 = arith.subf %43, %71 : vector<1x8xf32>
    %73 = math.exp %72 : vector<1x8xf32>
    %cst_43 = arith.constant dense<0.000000e+00> : vector<1xf32>
    %74 = vector.multi_reduction <add>, %73, %cst_43 [1] : vector<1x8xf32> to vector<1xf32>
    %75 = vector.shape_cast %74 : vector<1xf32> to vector<1x1xf32>
    %76 = arith.addf %70, %75 : vector<1x1xf32>
    %c0_44 = arith.constant 0 : index
    %c0_45 = arith.constant 0 : index
    %77 = vector.load %arg14[%c0_44, %c0_45] : memref<1x1xf32, #tpu.memory_space<vmem>>, vector<1x1xf32>
    tpu.vector_store %arg14[%c0_44, %c0_45], %76 {strides = array<i32>} : memref<1x1xf32, #tpu.memory_space<vmem>>, vector<1x1xf32>,
    %c0_46 = arith.constant 0 : index
    %c0_47 = arith.constant 0 : index
    %78 = vector.load %arg13[%c0_46, %c0_47] : memref<1x1xf32, #tpu.memory_space<vmem>>, vector<1x1xf32>
    tpu.vector_store %arg13[%c0_46, %c0_47], %66 {strides = array<i32>} : memref<1x1xf32, #tpu.memory_space<vmem>>, vector<1x1xf32>,
    %c1_i32_48 = arith.constant 1 : i32
    %79 = arith.cmpi eq, %arg1, %c1_i32_48 : i32
    %80 = arith.extui %79 : i1 to i32
    %c0_i32_49 = arith.constant 0 : i32
    %81 = arith.cmpi ne, %80, %c0_i32_49 : i32
    scf.if %81 {
      %c0_50 = arith.constant 0 : index
      %c0_51 = arith.constant 0 : index
      %82 = vector.load %arg11[%c0_50, %c0_51] : memref<1x1xf32, #tpu.memory_space<vmem>>, vector<1x1xf32>
      %c0_52 = arith.constant 0 : index
      %c0_53 = arith.constant 0 : index
      %83 = vector.load %arg12[%c0_52, %c0_53] : memref<1x1xf32, #tpu.memory_space<vmem>>, vector<1x1xf32>
      %84 = math.log %83 : vector<1x1xf32>
      %85 = arith.addf %82, %84 : vector<1x1xf32>
      %c0_54 = arith.constant 0 : index
      %c0_55 = arith.constant 0 : index
      %86 = vector.load %arg15[%c0_54, %c0_55] : memref<1x1xf32, #tpu.memory_space<vmem>>, vector<1x1xf32>
      %87 = arith.subf %85, %86 : vector<1x1xf32>
      %c0_56 = arith.constant 0 : index
      %c0_57 = arith.constant 0 : index
      %88 = vector.load %arg13[%c0_56, %c0_57] : memref<1x1xf32, #tpu.memory_space<vmem>>, vector<1x1xf32>
      %c0_58 = arith.constant 0 : index
      %c0_59 = arith.constant 0 : index
      %89 = vector.load %arg14[%c0_58, %c0_59] : memref<1x1xf32, #tpu.memory_space<vmem>>, vector<1x1xf32>
      %90 = math.log %89 : vector<1x1xf32>
      %91 = arith.addf %88, %90 : vector<1x1xf32>
      %c0_60 = arith.constant 0 : index
      %c0_61 = arith.constant 0 : index
      %92 = vector.load %arg16[%c0_60, %c0_61] : memref<1x1xf32, #tpu.memory_space<vmem>>, vector<1x1xf32>
      %93 = arith.subf %91, %92 : vector<1x1xf32>
      %94 = arith.addf %87, %93 : vector<1x1xf32>
      %95 = vector.shape_cast %94 : vector<1x1xf32> to vector<1x1x1xf32>
      %96 = vector.shape_cast %95 : vector<1x1x1xf32> to vector<1x1x1xf32>
      %97 = vector.broadcast %96 : vector<1x1x1xf32> to vector<1x1x128xf32>
      %c0_62 = arith.constant 0 : index
      %c0_63 = arith.constant 0 : index
      %c0_64 = arith.constant 0 : index
      %98 = vector.load %arg7[%c0_62, %c0_63, %c0_64] : memref<1x1x128xf32, #tpu.memory_space<vmem>>, vector<1x1x128xf32>
      tpu.vector_store %arg7[%c0_62, %c0_63, %c0_64], %97 {strides = array<i32>} : memref<1x1x128xf32, #tpu.memory_space<vmem>>, vector<1x1x128xf32>,
    } else {
    }
    return
  }
  func.func @transform_0(%arg0: i32, %arg1: i32, %arg2: memref<2x16xi32, #tpu.memory_space<smem>>) -> (i32, i32, i32) {
    %c0_i32 = arith.constant 0 : i32
    %c0_i32_0 = arith.constant 0 : i32
    %c0_i32_1 = arith.constant 0 : i32
    return %arg0, %c0_i32, %c0_i32_0 : i32, i32, i32
  }
  func.func @transform_1(%arg0: i32, %arg1: i32, %arg2: memref<2x16xi32, #tpu.memory_space<smem>>) -> (i32, i32, i32) {
    %c0_i32 = arith.constant 0 : i32
    %c0_i32_0 = arith.constant 0 : i32
    %c0_i32_1 = arith.constant 0 : i32
    return %arg0, %c0_i32, %c0_i32_0 : i32, i32, i32
  }
  func.func @transform_4(%arg0: i32, %arg1: i32, %arg2: memref<2x16xi32, #tpu.memory_space<smem>>) -> (i32, i32, i32) {
    %c0_i32 = arith.constant 0 : i32
    %c0_i32_0 = arith.constant 0 : i32
    %c0_i32_1 = arith.constant 0 : i32
    return %arg0, %c0_i32, %c0_i32_0 : i32, i32, i32
  }
}

</mosaic_0001>

<bundles_post_ra>
// kernel: tpu_custom_call.1
= control target key start
LH: loop header
LB: loop body
LE: loop exit
PB: predicated region body
PF: predicated region fallthrough
CT: control target
= control target key end

     0   :  { %s1382_s21 = smov [#allocation12]   ;;  %s1721_s0 = inlined_call_operand.hbm [shape: s32[2,16], index: 0, kind: input, shape index: {}]   ;;  %s1722_s1 = inlined_call_operand.hbm [shape: f32[2,1,128], index: 1, kind: input, shape index: {}]   ;;  %s1723_s2 = inlined_call_operand.hbm [shape: f32[2,1,128], index: 2, kind: input, shape index: {}]   ;;  %s1724_s3 = inlined_call_operand.hbm [shape: f32[64,128], index: 3, kind: input, shape index: {}]   ;;  %s1725_s4 = inlined_call_operand.hbm [shape: f32[64,128], index: 4, kind: input, shape index: {}]   ;;  %s1726_s5 = inlined_call_operand.hbm [shape: f32[2,1,128], index: 5, kind: output, shape index: {}]  }
   0x1   :  { %1739 = sst [smem:[#allocation44_spill]] %s1722_s1  ;;  %s11_s20 = sshll.u32 %s1721_s0, 4  ;;  %s12_s20 = int_to_ptr.hbm [resolvable:$true] %s11_s20 }
   0x2   :  { %1740 = sst [smem:[#allocation45_spill]] %s1723_s2 }
   0x3   :  { %14 = dma.hbm_to_smem %s12_s20, 32, %s1382_s21, [#allocation11] }
   0x4   :  { %1320 = dma.done.wait [#allocation11], 32 }
   0x5   :  { %1321 = vsyncadd [#allocation11], 4294967264 }
   0x6   :  { %17 = sfence }
   0x7   :  { %18 = vsyncpa [#allocation14], 0 }
   0x8   :  { %20 = vsyncpa [#allocation14 + $0x1], 0 }
   0x9   :  { %21 = vsyncpa [#allocation17], 0 }
   0xa   :  { %23 = vsyncpa [#allocation17 + $0x1], 0 }
   0xb   :  { %24 = vsyncpa [#allocation15], 0 }
   0xc   :  { %26 = vsyncpa [#allocation15 + $0x1], 0  ;;  %s1424_s22 = smov 0   ;;  %s1426_s23 = smov 0  }
   0xd   :  { %s1428_s24 = smov 0   ;;  %s1430_s25 = smov 0  }
   0xe   :  { %s1432_s0 = smov 0   ;;  %s1434_s26 = smov 0  }
   0xf   :  { %s1436_s27 = smov 0   ;;  %s1438_s28 = smov 0  }
  0x10 LB: > { %1741 = sst [smem:[#allocation35_spill]] %s1360_s26  ;;  %s924_s29 = sadd.s32 4294967295, %s1368_s28   ;;  %s1368_s28 = sphi %s1438_s28, %s32_s28   ;;  %s1364_s27 = sphi %s1436_s27, %s1777_s27   ;;  %s1360_s26 = sphi %s1434_s26, %s1776_s26   ;;  %s1356_s0 = sphi %s1432_s0, %s1775_s0   ;;  %s1352_s25 = sphi %s1430_s25, %s1774_s25   ;;  %s1348_s24 = sphi %s1428_s24, %s1780_s24   ;;  %s1344_s23 = sphi %s1426_s23, %s1779_s23   ;;  %s1340_s22 = sphi %s1424_s22, %s1778_s22  }
  0x11   : > { %1742 = sst [smem:[#allocation36_spill]] %s1364_s27  ;;  %s925_s30 = sadd.s32 4294967294, %s1368_s28  }
  0x12   : > { %s41_s6 = sadd.s32 1, %s1360_s26  ;;  %s44_s7 = sadd.s32 1, %s1364_s27 }
  0x13   : > { %p42_p0 = scmp.ge.s32.totalorder %s41_s6, 2  ;;  %s51_s8 = sadd.s32 1, %s1348_s24 }
  0x14   : > { %p58_p1 = scmp.ne.s32.totalorder %s1348_s24, %s1344_s23  ;;  %p59_p2 = scmp.eq.s32.totalorder %s1368_s28, 0 }
  0x15   : > { %s1782_s6 = smov (%p42_p0, %s41_s6), 0  ;;  %s1784_s7 = smov (!%p42_p0, %s44_s7), %s1364_s27 }
  0x16   : > { %1743 = sst [smem:[#allocation37_spill]] %s1782_s6  ;;  %p1475_p3 = por %p59_p2, %p58_p1 }
  0x17   : > { %p64_p4 = scmp.ne.s32.totalorder %s1344_s23, %s1340_s22  ;;  %p46_p5 = scmp.ge.s32.totalorder %s1784_s7, 2 }
  0x18   : > { %p65_p6 = scmp.eq.s32.totalorder %s924_s29, 0  ;;  %p114_p7 = scmp.eq.s32.totalorder %s924_s29, 3 }
  0x19   : > { %p120_p8 = scmp.eq.s32.totalorder %s925_s30, 3  ;;  %s1786_s7 = smov (%p46_p5, %s1784_s7), 0 }
  0x1a   : > { %1745 = sst [smem:[#allocation38_spill]] %s1786_s7  ;;  %p1483_p9 = por %p65_p6, %p64_p4 }
  0x1b   : > { %p1487_p10 = por %p114_p7, %p58_p1  ;;  %s48_s12 = ssub.s32 %s1364_s27, %s1786_s7 }
  0x1c   : > { %p1493_p11 = por %p120_p8, %p64_p4  ;;  %p49_p12 = scmp.eq.s32.totalorder %s48_s12, 0 }
  0x1d   : > { %p970_p13 = scmp.lt.s32.totalorder %s1368_s28, 4  ;;  %s140_s14 = sand.u32 1, %s1348_s24  }
  0x1e   : > { %s1500_s15 = scalar_select %p49_p12, %s1348_s24, %s51_s8  }
  0x1f   : > { %s1750_s1 = sld [smem:[#allocation44_spill]]  ;;  %s143_s19 = scalar_lea.vmem [#allocation13], %s140_s14 }
  0x20   : > { %1749 = sst [smem:[#allocation39_spill]] %s1500_s15  ;;  %s150_s20 = sshll.u32 %s143_s19, 4  ;;  %s151_s20 = int_to_ptr.vmem [resolvable:$true] %s150_s20 }
  0x21   : > { %p960_p0 = pnand %p970_p13, %p1475_p3  ;;  %p928_p1 = scmp.ge.s32.totalorder %s1368_s28, 1 }
  0x22   : > { %p172_p2 = scmp.lt.s32.totalorder %s1368_s28, 5  ;;  %s141_s29 = scalar_lea.sflag [#allocation14], %s140_s14 }
  0x23   : > { %s1751_s2 = sld [smem:[#allocation45_spill]]  ;;  %s160_s7 = scalar_lea.vmem [#allocation16], %s140_s14 }
  0x24   : > { %p173_p4 = pnand %p928_p1, %p172_p2  ;;  %s167_s6 = sshll.u32 %s160_s7, 4  ;;  %s168_s6 = int_to_ptr.vmem [resolvable:$true] %s167_s6 }
  0x25   : > { %s146_s18 = scalar_lea.hbm %s1750_s1, %s1364_s27  ;;  %s158_s17 = scalar_lea.sflag [#allocation17], %s140_s14 }
  0x26   : > { %s148_s21 = sshll.u32 %s146_s18, 4  ;;  %s1515_s9 = sand.u32 (!%p173_p4), 1, %s1344_s23   ;;  %s149_s21 = int_to_ptr.hbm [resolvable:$true] %s148_s21 }
  0x27   : > { %962 = dma.hbm_to_vmem [thread:$0]  (!%p960_p0), %s149_s21, 16, %s151_s20, %s141_s29  }
  0x28   : > { %176 = sbr.rel (%p173_p4) target bundleno = 928 (0x3a0), region = 28  ;;  %s179_s18 = scalar_lea.sflag (!%p173_p4), [#allocation14], %s1515_s9 }
  0x29   : > { %s163_s8 = scalar_lea.hbm %s1751_s2, %s1364_s27 }
  0x2a   : > { %s165_s16 = sshll.u32 %s163_s8, 4  ;;  %s166_s16 = int_to_ptr.hbm [resolvable:$true] %s165_s16 }
  0x2b   : > { %965 = dma.hbm_to_vmem [thread:$0]  (!%p960_p0), %s166_s16, 16, %s168_s6, %s158_s17  }
  0x2d   : > { %1323 = dma.done.wait (%p1483_p9), %s179_s18, 16  }
  0x2e   : > { %1325 = vsyncadd (%p1483_p9), %s179_s18, 4294967280  ;;  %s188_s7 = scalar_lea.sflag [#allocation17], %s1515_s9 }
  0x2f   : > { %1327 = dma.done.wait (%p1483_p9), %s188_s7, 16  }
  0x30   : > { %1329 = vsyncadd (%p1483_p9), %s188_s7, 4294967280  ;;  %p214_p3 = scmp.lt.s32.totalorder %s1352_s25, 0  ;;  %s215_s6 = ssub.s32 0, %s1352_s25 }
  0x31   : > { %s929_s20 = smin.u32 %s1352_s25, %s215_s6  ;;  %p932_p6 = scmp.ne.s32.totalorder %s1352_s25, 0 }
  0x32   : > { %s217_s21 = sand.u32 1, %s929_s20   ;;  %s1538_s10 = smov (!%p932_p6), 0  }
  0x33   : > { %s218_s29 = ssub.s32 0, %s217_s21  ;;  %229 = sbr.rel (%p932_p6) target bundleno = 127 (0x7f), region = 40 }
  0x34   : > { %s1788_s29 = smov (!%p214_p3, %s218_s29), %s217_s21 }
  0x35   : > { %p931_p5 = scmp.lt.s32.totalorder %s1788_s29, 0  ;;  %s224_s30 = sadd.s32 2, %s1788_s29 }
  0x37   : > { %s1790_s30 = smov (!%p931_p5, %s224_s30), %s1788_s29 }
  0x38   : > { %vm230_vm0 = vcmask 0   ;;  %v1383_v0 = vmov -1e+30   ;;  %v1384_v1 = vmov 0.0  }
  0x39   : > { %231 = vst.msk [vmem:[#allocation5] sm:$0x1] %vm230_vm0, %v1383_v0 }
  0x3a   : > { %232 = vst.msk [vmem:[#allocation7] sm:$0x1] %vm230_vm0, %v1383_v0 }
  0x3b   : > { %233 = vst.msk [vmem:[#allocation6] sm:$0x1] %vm230_vm0, %v1384_v1 }
  0x3c   : > { %234 = vst.msk [vmem:[#allocation8] sm:$0x1] %vm230_vm0, %v1384_v1 }
  0x3d LB: >> { %s241_s8 = sshra.s32 %s1372_s10, 7  ;;  %s246_s16 = sand.u32 127, %s1372_s10  ;;  %s1372_s10 = sphi %s1538_s10, %s240_s10  }
  0x3e   : >> { %s243_s17 = sadd.s32 %s1356_s0, %s241_s8  ;;  %s250_s20 = scalar_lea.vmem [#allocation2], %s1372_s10 }
  0x3f   : >> { %s933_s18 = sshll.u32 %s243_s17, 7  ;;  %s1547_s21 = sshll.u32 %s250_s20, 4  ;;  %s261_s21 = int_to_ptr.vmem [resolvable:$true] %s1547_s21 }
  0x40   : >> { %s247_s7 = sadd.s32 %s933_s18, %s246_s16  ;;  %s265_s29 = scalar_lea.vmem [#allocation3], %s1372_s10 }
  0x41   : >> { %s248_s6 = sld [smem:[#allocation12 + %s247_s7]]  ;;  %s1550_s12 = sshll.u32 %s265_s29, 4 }
  0x42   : >> { %1752 = sst [smem:[#allocation40_spill]] %s1550_s12  ;;  %s1156_s12 = scalar_lea.hbm %s1724_s3, 64 }
  0x47   : >> { %s249_s1 = scalar_lea.hbm %s1724_s3, %s248_s6  ;;  %s264_s8 = scalar_lea.hbm %s1725_s4, %s248_s6 }
  0x48   : >> { %s258_s16 = sshll.u32 %s249_s1, 4  ;;  %s1560_s17 = sshll.u32 %s264_s8, 4  ;;  %s259_s16 = int_to_ptr.hbm [resolvable:$true] %s258_s16  ;;  %s275_s17 = int_to_ptr.hbm [resolvable:$true] %s1560_s17 }
  0x49   : >> { %s1152_s18 = sshra.s32 %s259_s16, 4  ;;  %s1153_s18 = int_to_ptr.hbm [resolvable:$true] %s1152_s18 }
  0x4a   : >> { %s1154_s7 = scalar_lea.hbm %s1153_s18, 1  ;;  %p1157_p8 = scmp.lt.s32.totalorder %s1153_s18, %s1724_s3 }
  0x4b   : >> { %p1155_p7 = scmp.ne.s32.totalorder %s1153_s18, %s1154_s7  ;;  %p1158_p9 = scmp.lt.s32.totalorder %s1156_s12, %s1154_s7 }
  0x4d   : >> { %p1159_p12 = por %p1158_p9, %p1157_p8 }
  0x4f   : >> { %p1160_p13 = pnand %p1159_p12, %p1155_p7 }
  0x51   : >> { %1163 = shalt.err (!%p1160_p13)  }
  0x52   : >> { %s1164_s1 = sshra.s32 %s261_s21, 4  ;;  %s1385_s27 = smov [#allocation2]   ;;  %s1165_s1 = int_to_ptr.vmem [resolvable:$true] %s1164_s1 }
  0x53   : >> { %s1166_s2 = scalar_lea.vmem %s1165_s1, 1  ;;  %s1168_s6 = scalar_lea.vmem %s1385_s27, 16 }
  0x54   : >> { %p1167_p0 = scmp.ne.s32.totalorder %s1165_s1, %s1166_s2  ;;  %p1169_p1 = scmp.lt.s32.totalorder %s1165_s1, [#allocation2] }
  0x55   : >> { %p1170_p2 = scmp.lt.s32.totalorder %s1168_s6, %s1166_s2 }
  0x57   : >> { %p1171_p4 = por %p1170_p2, %p1169_p1 }
  0x59   : >> { %p1172_p3 = pnand %p1171_p4, %p1167_p0 }
  0x5b   : >> { %1175 = shalt.err (!%p1172_p3)  }
  0x5c   : >> { %263 = dma.hbm_to_vmem [thread:$0]  %s259_s16, 16, %s261_s21, [#allocation4] }
  0x5d   : >> { %s1176_s12 = sshra.s32 %s275_s17, 4  ;;  %s1180_s20 = scalar_lea.hbm %s1725_s4, 64  ;;  %s1177_s12 = int_to_ptr.hbm [resolvable:$true] %s1176_s12 }
  0x5e   : >> { %s1178_s8 = scalar_lea.hbm %s1177_s12, 1  ;;  %p1181_p7 = scmp.lt.s32.totalorder %s1177_s12, %s1725_s4 }
  0x5f   : >> { %p1179_p5 = scmp.ne.s32.totalorder %s1177_s12, %s1178_s8  ;;  %p1182_p8 = scmp.lt.s32.totalorder %s1180_s20, %s1178_s8 }
  0x61   : >> { %p1183_p9 = por %p1182_p8, %p1181_p7 }
  0x63   : >> { %p1184_p12 = pnand %p1183_p9, %p1179_p5 }
  0x65   : >> { %1187 = shalt.err (!%p1184_p12)  }
  0x66   : >> { %s1753_s14 = sld [smem:[#allocation40_spill]]  ;;  %s1386_s2 = smov [#allocation3]  }
  0x67   : >> { %s1192_s27 = scalar_lea.vmem %s1386_s2, 16 }
  0x6c   : >> { %s1754_s1 = int_to_ptr.vmem [resolvable:$true] %s1753_s14 }
  0x6d   : >> { %s1188_s21 = sshra.s32 %s1754_s1, 4  ;;  %s1189_s21 = int_to_ptr.vmem [resolvable:$true] %s1188_s21 }
  0x6e   : >> { %s1190_s16 = scalar_lea.vmem %s1189_s21, 1  ;;  %p1193_p0 = scmp.lt.s32.totalorder %s1189_s21, [#allocation3] }
  0x6f   : >> { %p1191_p13 = scmp.ne.s32.totalorder %s1189_s21, %s1190_s16  ;;  %p1194_p1 = scmp.lt.s32.totalorder %s1192_s27, %s1190_s16 }
  0x71   : >> { %p1195_p2 = por %p1194_p1, %p1193_p0 }
  0x73   : >> { %p1196_p4 = pnand %p1195_p2, %p1191_p13 }
  0x75   : >> { %1199 = shalt.err (!%p1196_p4)  }
  0x76   : >> { %s1755_s6 = smov %s1754_s1  ;;  %s240_s10 = sadd.s32 1, %s1372_s10  }
  0x77   : >> { %279 = dma.hbm_to_vmem [thread:$0]  %s275_s17, 16, %s1755_s6, [#allocation4 + $0x2] }
  0x78   : >> { %p237_p3 = scmp.ge.s32.totalorder %s240_s10, 8  }
  0x7a   : > { %239 = sbr.rel (!%p237_p3) target bundleno = 61 (0x3d), region = 157 }
  0x7f PF: > { %s280_s12 = sadd.s32 1, %s1352_s25 }
  0x80   : > { %p934_p5 = scmp.ge.s32.totalorder %s280_s12, 2 }
  0x81   : > { %p285_p7 = scmp.lt.s32.totalorder (!%p934_p5), %s280_s12, 0  ;;  %s286_s8 = ssub.s32 (!%p934_p5), 0, %s280_s12 }
  0x82   : > { %284 = sbr.rel (%p934_p5) target bundleno = 220 (0xdc), region = 59  ;;  %s935_s18 = smin.u32 (!%p934_p5), %s286_s8, %s280_s12 }
  0x83   : > { %s951_s7 = sshll.u32 (!%p934_p5), %s1352_s25, 3  ;;  %s288_s20 = sand.u32 (!%p934_p5), 1, %s935_s18  }
  0x84   : > { %s1592_s29 = sadd.s32 (!%p934_p5), 8, %s951_s7  ;;  %s289_s17 = ssub.s32 (!%p934_p5), 0, %s288_s20 }
  0x85   : > { %s1596_s10 = smov (!%p934_p5), 0  }
  0x87   : > { %s1792_s17 = smov (!%p285_p7, %s289_s17), %s288_s20 }
  0x88   : > { %p937_p8 = scmp.lt.s32.totalorder %s1792_s17, 0  ;;  %s295_s19 = sadd.s32 2, %s1792_s17 }
  0x8a   : > { %s1794_s19 = smov (!%p937_p8, %s295_s19), %s1792_s17 }
  0x8b LB: >> { %s940_s14 = sshll.u32 %s1794_s19, 3  ;;  %s304_s1 = sadd.s32 %s1376_s10, %s1592_s29  ;;  %s1376_s10 = sphi %s1596_s10, %s303_s10  }
  0x8c   : >> { %s315_s21 = sadd.s32 %s1376_s10, %s940_s14  ;;  %s305_s16 = sshra.s32 %s304_s1, 7 }
  0x8d   : >> { %s310_s2 = sand.u32 127, %s304_s1  ;;  %s307_s27 = sadd.s32 %s1356_s0, %s305_s16 }
  0x8e   : >> { %s939_s6 = sshll.u32 %s307_s27, 7  ;;  %s316_s18 = scalar_lea.vmem [#allocation2], %s315_s21 }
  0x8f   : >> { %s311_s12 = sadd.s32 %s939_s6, %s310_s2  ;;  %s1606_s7 = sshll.u32 %s316_s18, 4 }
  0x90   : >> { %s312_s8 = sld [smem:[#allocation12 + %s311_s12]]  ;;  %s332_s20 = scalar_lea.vmem [#allocation3], %s315_s21 }
  0x91   : >> { %1756 = sst [smem:[#allocation41_spill]] %s1606_s7  ;;  %s1608_s17 = sshll.u32 %s332_s20, 4 }
  0x92   : >> { %1757 = sst [smem:[#allocation42_spill]] %s1608_s17  ;;  %s1732_s26 = scalar_lea.sflag [#allocation4], %s1794_s19 }
  0x93   : >> { %s1614_s15 = scalar_lea.sflag %s1732_s26, 2 [#allocation4]  ;;  %s1204_s7 = scalar_lea.hbm %s1724_s3, 64 }
  0x96   : >> { %s313_s16 = scalar_lea.hbm %s1724_s3, %s312_s8  ;;  %s331_s6 = scalar_lea.hbm %s1725_s4, %s312_s8 }
  0x97   : >> { %s325_s12 = sshll.u32 %s313_s16, 4  ;;  %s1623_s18 = sshll.u32 %s331_s6, 4  ;;  %s326_s12 = int_to_ptr.hbm [resolvable:$true] %s325_s12 }
  0x98   : >> { %1758 = sst [smem:[#allocation43_spill]] %s1623_s18  ;;  %s1200_s21 = sshra.s32 %s326_s12, 4  ;;  %s1201_s21 = int_to_ptr.hbm [resolvable:$true] %s1200_s21 }
  0x99   : >> { %s1202_s20 = scalar_lea.hbm %s1201_s21, 1  ;;  %p1205_p12 = scmp.lt.s32.totalorder %s1201_s21, %s1724_s3 }
  0x9a   : >> { %p1203_p9 = scmp.ne.s32.totalorder %s1201_s21, %s1202_s20  ;;  %p1206_p13 = scmp.lt.s32.totalorder %s1204_s7, %s1202_s20 }
  0x9c   : >> { %p1207_p0 = por %p1206_p13, %p1205_p12 }
  0x9e   : >> { %p1208_p1 = pnand %p1207_p0, %p1203_p9 }
  0xa0   : >> { %1211 = shalt.err (!%p1208_p1)  }
  0xa1   : >> { %s1759_s8 = sld [smem:[#allocation41_spill]]  ;;  %s1387_s6 = smov [#allocation2]  }
  0xa2   : >> { %s1216_s18 = scalar_lea.vmem %s1387_s6, 16 }
  0xa7   : >> { %s1760_s16 = int_to_ptr.vmem [resolvable:$true] %s1759_s8 }
  0xa8   : >> { %s1212_s2 = sshra.s32 %s1760_s16, 4  ;;  %s1213_s2 = int_to_ptr.vmem [resolvable:$true] %s1212_s2 }
  0xa9   : >> { %s1214_s27 = scalar_lea.vmem %s1213_s2, 1  ;;  %p1217_p4 = scmp.lt.s32.totalorder %s1213_s2, [#allocation2] }
  0xaa   : >> { %p1215_p2 = scmp.ne.s32.totalorder %s1213_s2, %s1214_s27  ;;  %p1218_p3 = scmp.lt.s32.totalorder %s1216_s18, %s1214_s27 }
  0xac   : >> { %p1219_p5 = por %p1218_p3, %p1217_p4 }
  0xae   : >> { %p1220_p7 = pnand %p1219_p5, %p1215_p2 }
  0xb0   : >> { %1223 = shalt.err (!%p1220_p7)  }
  0xb1   : >> { %s1761_s26 = scalar_lea.sflag [#allocation4], %s1794_s19  ;;  %s1762_s7 = smov %s1760_s16 }
  0xb2   : >> { %s1763_s17 = sld [smem:[#allocation43_spill]]  ;;  %s1228_s6 = scalar_lea.hbm %s1725_s4, 64 }
  0xb3   : >> { %330 = dma.hbm_to_vmem [thread:$0]  %s326_s12, 16, %s1762_s7, %s1761_s26 }
  0xb8   : >> { %s1764_s21 = int_to_ptr.hbm [resolvable:$true] %s1763_s17 }
  0xb9   : >> { %s1224_s20 = sshra.s32 %s1764_s21, 4  ;;  %s1225_s20 = int_to_ptr.hbm [resolvable:$true] %s1224_s20 }
  0xba   : >> { %s1226_s14 = scalar_lea.hbm %s1225_s20, 1  ;;  %p1229_p9 = scmp.lt.s32.totalorder %s1225_s20, %s1725_s4 }
  0xbb   : >> { %p1227_p8 = scmp.ne.s32.totalorder %s1225_s20, %s1226_s14  ;;  %p1230_p12 = scmp.lt.s32.totalorder %s1228_s6, %s1226_s14 }
  0xbd   : >> { %p1231_p13 = por %p1230_p12, %p1229_p9 }
  0xbf   : >> { %p1232_p0 = pnand %p1231_p13, %p1227_p8 }
  0xc1   : >> { %1235 = shalt.err (!%p1232_p0)  }
  0xc2   : >> { %s1765_s8 = sld [smem:[#allocation42_spill]]  ;;  %s1388_s7 = smov [#allocation3]  }
  0xc3   : >> { %s1240_s21 = scalar_lea.vmem %s1388_s7, 16 }
  0xc8   : >> { %s1766_s27 = int_to_ptr.vmem [resolvable:$true] %s1765_s8 }
  0xc9   : >> { %s1236_s12 = sshra.s32 %s1766_s27, 4  ;;  %s1237_s12 = int_to_ptr.vmem [resolvable:$true] %s1236_s12 }
  0xca   : >> { %s1238_s26 = scalar_lea.vmem %s1237_s12, 1  ;;  %p1241_p2 = scmp.lt.s32.totalorder %s1237_s12, [#allocation3] }
  0xcb   : >> { %p1239_p1 = scmp.ne.s32.totalorder %s1237_s12, %s1238_s26  ;;  %p1242_p4 = scmp.lt.s32.totalorder %s1240_s21, %s1238_s26 }
  0xcd   : >> { %p1243_p3 = por %p1242_p4, %p1241_p2 }
  0xcf   : >> { %p1244_p5 = pnand %p1243_p3, %p1239_p1 }
  0xd1   : >> { %1247 = shalt.err (!%p1244_p5)  }
  0xd2   : >> { %s1767_s20 = smov %s1766_s27  ;;  %s1768_s14 = int_to_ptr.hbm [resolvable:$true] %s1763_s17 }
  0xd3   : >> { %347 = dma.hbm_to_vmem [thread:$0]  %s1768_s14, 16, %s1767_s20, %s1614_s15 }
  0xd4   : >> { %s303_s10 = sadd.s32 1, %s1376_s10  }
  0xd5   : >> { %p300_p7 = scmp.ge.s32.totalorder %s303_s10, 8  }
  0xd7   : > { %302 = sbr.rel (!%p300_p7) target bundleno = 139 (0x8b), region = 168 }
  0xdc PF: > { %s1378_s1 = smov 0  }
  0xdd LB: >> { %s354_s16 = scalar_lea.sflag [#allocation4], %s1790_s30  ;;  %s1380_s1 = sphi %s1378_s1, %s353_s1  }
  0xde   : >> { %1330 = dma.done.wait %s354_s16, 16 }
  0xdf   : >> { %1331 = vsyncadd %s354_s16, 4294967280  ;;  %s855_s6 = scalar_lea.sflag %s354_s16, 2 [#allocation4] }
  0xe0   : >> { %1332 = dma.done.wait %s855_s6, 16 }
  0xe1   : >> { %1333 = vsyncadd %s855_s6, 4294967280  ;;  %s353_s1 = sadd.s32 1, %s1380_s1  }
  0xe2   : >> { %p350_p8 = scmp.ge.s32.totalorder %s353_s1, 8  }
  0xe3   : > { %s941_s15 = sshll.u32 (%p350_p8), %s1790_s30, 3  ;;  %s1769_s29 = scalar_lea.vmem (%p350_p8), [#allocation13], %s1515_s9  ;;  %v664_v28 = vlaneseq (%p350_p8) }
  0xe4   : > { %352 = sbr.rel (!%p350_p8) target bundleno = 221 (0xdd), region = 179  ;;  %v367_v2 = vld [vmem:[%s1769_s29] sm:$0x1] (%p350_p8)  ;;  %s1770_s19 = scalar_lea.vmem (%p350_p8), [#allocation16], %s1515_s9 }
  0xe5   : > { %v368_v3 = vld [vmem:[%s1770_s19] sm:$0x1] (%p350_p8)  ;;  %v386_v4 = vand.u32 (%p350_p8), 4294901760, %v367_v2  ;;  %s365_s10 = scalar_lea.vmem (%p350_p8), [#allocation3], %s941_s15  ;;  %s363_s17 = scalar_lea.vmem (%p350_p8), [#allocation2], %s941_s15  ;;  %v665_v32 = vand.u32 (%p350_p8), 127, %v664_v28 }
  0xe6   : > { %v533_v5 = vand.u32 (%p350_p8), 4294901760, %v368_v3  ;;  %v366_v6 = vld [vmem:[%s365_s10] sm:$0xff] (%p350_p8)  ;;  %s942_s30 = sshll.u32 (%p350_p8), %s1352_s25, 3 }
  0xe7   : > { %v364_v7 = vld [vmem:[%s363_s17] sm:$0xff] (%p350_p8)  ;;  %v384_v8 = vand.u32 (%p350_p8), 4294901760, %v366_v6  ;;  %v387_v9 = vsub.f32 (%p350_p8), %v367_v2, %v386_v4  ;;  %v666_v35 = vstv (%p350_p8), %s942_s30 }
  0xe8   : > { %v531_v10 = vand.u32 (%p350_p8), 4294901760, %v364_v7  ;;  %v534_v11 = vsub.f32 (%p350_p8), %v368_v3, %v533_v5  ;;  %v667_v37 = vadd.s32 (%p350_p8), %v666_v35, %v665_v32 }
  0xe9   : > { %385 = vmatpush.xpose.msra.mxu0 %v384_v8  ;;  %v411_v12 = vsub.f32 %v366_v6, %v384_v8  ;;  %461 = vmatpush.xpose.msra.mxu3 %v384_v8  ;;  %v388_v13 = vand.u32 4294901760, %v387_v9 }
  0xea   : > { %v558_v14 = vsub.f32 %v364_v7, %v531_v10  ;;  %v535_v15 = vand.u32 4294901760, %v534_v11  ;;  %vm668_vm1 = vcmp.lt.s32.totalorder %v667_v37, 9 }
  0xeb   : > { %438 = vmatpush.xpose.msra.mxu2 %v411_v12  ;;  %v389_v16 = vsub.f32 %v387_v9, %v388_v13  ;;  %v412_v17 = vand.u32 4294901760, %v411_v12 }
  0xec   : > { %v559_v18 = vand.u32 4294901760, %v558_v14  ;;  %465 = vmatmul.f32.vlgmr.msra.gmra.mxu3 %v388_v13  ;;  %v536_v22 = vsub.f32 %v534_v11, %v535_v15 }
  0xed   : > { %v390_v19 = vand.u32 4294901760, %v389_v16  ;;  %v413_v20 = vsub.f32 %v411_v12, %v412_v17  ;;  %487 = vmatpush.xpose.msrb.mxu0 %v412_v17 }
  0xee   : > { %v560_v21 = vsub.f32 %v558_v14, %v559_v18  ;;  %441 = vmatmul.f32.vlgmr.msra.gmra.mxu2 %v387_v9  ;;  %v537_v25 = vand.u32 4294901760, %v536_v22 }
  0xef   : > { %532 = vmatpush.xpose.msrb.mxu2 %v531_v10  ;;  %391 = vmatmul.f32.vlgmr.msra.gmra.mxu0 %v390_v19  ;;  %v414_v23 = vand.u32 4294901760, %v413_v20 }
  0xf0   : > { %v561_v24 = vand.u32 4294901760, %v560_v21 }
  0xf1   : > { %585 = vmatpush.xpose.msra.mxu0 %v558_v14  ;;  %415 = vmatpush.xpose.msra.mxu1 %v414_v23 }
  0xf2   : > { %562 = vmatpush.xpose.msrb.mxu3 %v561_v24 }
  0xf3   : > { %634 = vmatpush.xpose.msra.mxu2 %v559_v18 }
  0xf4   : > { %417 = vmatmul.f32.vlgmr.msra.gmra.mxu1 %v386_v4 }
  0xf5   : > { %509 = vmatpush.xpose.msrb.mxu1 %v384_v8  ;;  %564 = vmatmul.f32.vlgmr.msrb.gmra.mxu3 %v533_v5 }
  0xf6   : > { %656 = vmatpush.xpose.msra.mxu3 %v531_v10  ;;  %538 = vmatmul.f32.vlgmr.msrb.gmra.mxu2 %v537_v25 }
  0xf7   : > { %489 = vmatmul.f32.vlgmr.msrb.gmra.mxu0 %v386_v4 }
  0xf9   : > { %608 = vmatpush.xpose.msra.mxu1 %v531_v10 }
  0xfc   : > { %511 = vmatmul.f32.vlgmr.msrb.gmra.mxu1 %v386_v4 }
  0xfd   : > { %658 = vmatmul.f32.vlgmr.msra.gmra.mxu3 %v533_v5 }
  0xfe   : > { %636 = vmatmul.f32.vlgmr.msra.gmra.mxu2 %v533_v5 }
  0xff   : > { %588 = vmatmul.f32.vlgmr.msra.gmra.mxu0 %v534_v11 }
 0x104   : > { %612 = vmatmul.f32.vlgmr.msra.gmra.mxu1 %v535_v15 }
 0x16c   : > { %v392_v26 = vpop.f32.mrf.mxu0 }
 0x16f   : > { %v466_v27 = vpop.f32.mrf.mxu3 }
 0x171   : > { %v418_v29 = vpop.f32.mrf.mxu1  ;;  %v442_v30 = vpop.f32.mrf.mxu2 }
 0x172   : > { %v419_v31 = vadd.f32 %v418_v29, %v392_v26 }
 0x174   : > { %v443_v33 = vadd.f32 %v442_v30, %v419_v31  ;;  %v490_v34 = vpop.f32.mrf.mxu0 }
 0x176   : > { %v467_v36 = vadd.f32 %v466_v27, %v443_v33 }
 0x178   : > { %v491_v38 = vadd.f32 %v490_v34, %v467_v36  ;;  %v565_v39 = vpop.f32.mrf.mxu3 }
 0x179   : > { %v512_v40 = vpop.f32.mrf.mxu1  ;;  %v539_v41 = vpop.f32.mrf.mxu2 }
 0x17a   : > { %v513_v42 = vadd.f32 %v512_v40, %v491_v38  ;;  %v566_v44 = vadd.f32 %v565_v39, %v539_v41 }
 0x17c   : > { %v515_v43 = vmul.f32 14.285714, %v513_v42  ;;  %v589_v45 = vpop.f32.mrf.mxu0 }
 0x17d   : > { %v590_v47 = vadd.f32 %v589_v45, %v566_v44 }
 0x17e   : > { %v669_v46 = vsel %vm668_vm1, %v515_v43, -1e+30 }
 0x180   : > { %v659_v51 = vpop.f32.mrf.mxu3 }
 0x181   : > { %v613_v48 = vpop.f32.mrf.mxu1  ;;  %v637_v49 = vpop.f32.mrf.mxu2 }
 0x182   : > { %v614_v50 = vadd.f32 %v613_v48, %v590_v47 }
 0x184   : > { %v638_v52 = vadd.f32 %v637_v49, %v614_v50 }
 0x186   : > { %v660_v53 = vadd.f32 %v659_v51, %v638_v52  ;;  %673 = sbr.rel (%p932_p6) target bundleno = 398 (0x18e), region = 85 }
 0x188   : > { %v662_v54 = vmul.f32 14.285714, %v660_v53 }
 0x18a   : > { %v670_v55 = vsel %vm668_vm1, %v662_v54, -1e+30 }
 0x18b   : > { %vm674_vm2 = vcmask 0  }
 0x18c   : > { %675 = vst.msk [vmem:[#allocation9] sm:$0x1] %vm674_vm2, %v669_v46 }
 0x18d   : > { %676 = vst.msk [vmem:[#allocation10] sm:$0x1] %vm674_vm2, %v670_v55 }
 0x18e PF: > { %vm678_vm3 = vcmask 57344   ;;  %v1389_v58 = vmov 0   ;;  %v677_v59 = vld [vmem:[#allocation5] sm:$0x1]  ;;  %vm701_vm4 = vcmask 0   ;;  %p944_p6 = scmp.ne.s32.totalorder %s1352_s25, 1 }
 0x18f   : > { %v679_v56 = vsel %vm678_vm3, %v669_v46, -inf  ;;  %v705_v57 = vsel %vm678_vm3, %v670_v55, -inf  ;;  %1065 = vset.pattern.permute.xlu1 %v1389_v58  ;;  %1066 = vset.pattern.permute.xlu0 %v1389_v58  ;;  %v704_v63 = vld [vmem:[#allocation7] sm:$0x1]  ;;  %v683_v18 = vld [vmem:[#allocation6] sm:$0x1] }
 0x190   : > { %680 = vmax.xlane.f32.xlu0 %v679_v56  ;;  %v709_v23 = vld [vmem:[#allocation8] sm:$0x1]  ;;  %s1771_s25 = scalar_lea.vmem (!%p944_p6), [#allocation18], %s1515_s9 }
 0x198   : > { %706 = vmax.xlane.f32.xlu0 %v705_v57 }
 0x203   : > { %v681_v60 = vpop.xlane.xlu0 %680 }
 0x204   : > { %v682_v61 = vmax.f32 %v677_v59, %v681_v60 }
 0x206   : > { %v684_v62 = vsub.f32 %v677_v59, %v682_v61  ;;  %703 = vst.msk [vmem:[#allocation5] sm:$0x1] %vm701_vm4, %v682_v61  ;;  %690 = vperm.xlu1 %1065, %v682_v61  }
 0x208   : > { %v685_v15 = vmul.f32 1.442695, %v684_v62 }
 0x20b   : > { %v707_v0 = vpop.xlane.xlu0 %706 }
 0x20c   : > { %v708_v1 = vmax.f32 %v704_v63, %v707_v0 }
 0x20e   : > { %v710_v2 = vsub.f32 %v704_v63, %v708_v1  ;;  %728 = vst.msk [vmem:[#allocation7] sm:$0x1] %vm701_vm4, %v708_v1  ;;  %716 = vperm.xlu1 %1065, %v708_v1  }
 0x210   : > { %v711_v16 = vmul.f32 1.442695, %v710_v2 }
 0x278   : > { %v691_v3 = vpop.permute.xlu1 %690 }
 0x279   : > { %v693_v4 = vperm.slane %v691_v3, 0 }
 0x27b   : > { %v694_v5 = vsub.f32 %v669_v46, %v693_v4 }
 0x27d   : > { %v695_v6 = vmul.f32 1.442695, %v694_v5 }
 0x27f   : > { %1067 = vpow2.f32 %v695_v6 }
 0x280   : > { %v717_v7 = vpop.permute.xlu1 %716 }
 0x281   : > { %v719_v8 = vperm.slane %v717_v7, 0 }
 0x283   : > { %v720_v9 = vsub.f32 %v670_v55, %v719_v8 }
 0x285   : > { %v1068_v10 = vpop.eup %1067  ;;  %v721_v11 = vmul.f32 1.442695, %v720_v9 }
 0x286   : > { %v697_v12 = vsel %vm678_vm3, %v1068_v10, 0.0 }
 0x287   : > { %1069 = vpow2.f32 %v721_v11  ;;  %698 = vadd.xlane.f32.xlu2 %v697_v12 }
 0x288   : > { %1071 = vpow2.f32 %v685_v15 }
 0x289   : > { %1073 = vpow2.f32 %v711_v16 }
 0x28d   : > { %v1070_v13 = vpop.eup %1069 }
 0x28e   : > { %v723_v14 = vsel %vm678_vm3, %v1070_v13, 0.0  ;;  %v1072_v17 = vpop.eup %1071 }
 0x28f   : > { %724 = vadd.xlane.f32.xlu2 %v723_v14  ;;  %v687_v19 = vmul.f32 %v1072_v17, %v683_v18  ;;  %v1074_v22 = vpop.eup %1073 }
 0x290   : > { %v713_v24 = vmul.f32 %v1074_v22, %v709_v23 }
 0x2fa   : > { %v699_v20 = vpop.xlane.xlu2 %698 }
 0x2fb   : > { %v700_v21 = vadd.f32 %v699_v20, %v687_v19 }
 0x2fd   : > { %702 = vst.msk [vmem:[#allocation6] sm:$0x1] %vm701_vm4, %v700_v21 }
 0x301   : > { %732 = sbr.rel (%p944_p6) target bundleno = 914 (0x392), region = 89 }
 0x302   : > { %v725_v25 = vpop.xlane.xlu2 %724 }
 0x303   : > { %v726_v26 = vadd.f32 %v725_v25, %v713_v24 }
 0x305   : > { %727 = vst.msk [vmem:[#allocation8] sm:$0x1] %vm701_vm4, %v726_v26 }
 0x306   : > { %v734_v27 = vld [vmem:[#allocation6] sm:$0x1]  ;;  %v1390_v28 = vmov 0   ;;  %v733_v31 = vld [vmem:[#allocation5] sm:$0x1] }
 0x307   : > { %1075 = vset.pattern.permute.xlu0 %v1390_v28  ;;  %1076 = vlog2.f32 %v734_v27  ;;  %v740_v34 = vld [vmem:[#allocation7] sm:$0x1]  ;;  %v738_v35 = vld [vmem:[#allocation9] sm:$0x1]  ;;  %v745_v38 = vld [vmem:[#allocation10] sm:$0x1] }
 0x30c   : > { %v741_v29 = vld [vmem:[#allocation8] sm:$0x1] }
 0x30d   : > { %1078 = vlog2.f32 %v741_v29  ;;  %v1077_v30 = vpop.eup %1076 }
 0x30e   : > { %v736_v33 = vmul.f32 0.6931472, %v1077_v30 }
 0x310   : > { %v737_v37 = vadd.f32 %v736_v33, %v733_v31 }
 0x312   : > { %v739_v40 = vsub.f32 %v737_v37, %v738_v35 }
 0x313   : > { %v1079_v32 = vpop.eup %1078 }
 0x314   : > { %v743_v36 = vmul.f32 0.6931472, %v1079_v32 }
 0x316   : > { %v744_v39 = vadd.f32 %v743_v36, %v740_v34 }
 0x318   : > { %v746_v41 = vsub.f32 %v744_v39, %v745_v38 }
 0x31a   : > { %v747_v42 = vadd.f32 %v746_v41, %v739_v40 }
 0x31c   : > { %750 = vperm.xlu0 %1075, %v747_v42  }
 0x38e   : > { %v751_v43 = vpop.permute.xlu0 %750 }
 0x38f   : > { %v753_v44 = vperm.slane %v751_v43, 0 }
 0x391   : > { %754 = vst [vmem:[%s1771_s25] sm:$0x1] %v753_v44 }
 0x392 PF: > { %s764_s8 = scalar_lea.hbm %s1726_s5, %s1356_s0  ;;  %s1772_s27 = scalar_lea.vmem [#allocation18], %s1515_s9 }
 0x393   : > { %s766_s12 = sshll.u32 %s1772_s27, 4  ;;  %s768_s26 = sshll.u32 %s764_s8, 4  ;;  %s767_s12 = int_to_ptr.vmem [resolvable:$true] %s766_s12  ;;  %s769_s26 = int_to_ptr.hbm [resolvable:$true] %s768_s26 }
 0x394   : > { %s756_s7 = scalar_lea.sflag [#allocation15], %s1515_s9  ;;  %s1262_s21 = sshra.s32 %s769_s26, 4  ;;  %s1263_s21 = int_to_ptr.hbm [resolvable:$true] %s1262_s21 }
 0x395   : > { %s1264_s20 = scalar_lea.hbm %s1263_s21, 1  ;;  %s1268_s16 = scalar_lea.hbm %s1726_s5, 2 }
 0x396   : > { %p1265_p9 = scmp.ne.s32.totalorder %s1263_s21, %s1264_s20  ;;  %p1269_p0 = scmp.lt.s32.totalorder %s1263_s21, %s1726_s5 }
 0x397   : > { %p1270_p1 = scmp.lt.s32.totalorder %s1268_s16, %s1264_s20 }
 0x398   : > { %p1266_p12 = pnand %p1265_p9, %p1487_p10 }
 0x399   : > { %p1271_p2 = por %p1270_p1, %p1269_p0 }
 0x39a   : > { %p1267_p13 = pneg %p1266_p12 }
 0x39c   : > { %p1272_p4 = pnand %p1271_p2, %p1267_p13 }
 0x39e   : > { %1275 = shalt.err (!%p1272_p4)
}
 0x39f   : > { %957 = dma.vmem_to_hbm [thread:$0]  (%p1487_p10), %s767_s12, 16, %s769_s26, %s756_s7  }
 0x3a0 PF: > { %p971_p3 = scmp.ge.s32.totalorder %s1368_s28, 2  ;;  %s780_s0 = sand.u32 1, %s1340_s22  }
 0x3a1   : > { %s781_s9 = scalar_lea.sflag [#allocation15], %s780_s0 }
 0x3a2   : > { %p967_p5 = pnand %p971_p3, %p1493_p11 }
 0x3a4   : > { %p968_p7 = pneg %p967_p5 }
 0x3a6   : > { %1335 = dma.done.wait (%p968_p7), %s781_s9, 16  }
 0x3a7   : > { %1337 = vsyncadd (%p968_p7), %s781_s9, 4294967280  ;;  %s32_s28 = sadd.s32 1, %s1368_s28   ;;  %s1773_s29 = sld [smem:[#allocation39_spill]] }
 0x3a8   : > { %p29_p8 = scmp.ge.s32.totalorder %s32_s28, 6   ;;  %s1774_s25 = sld [smem:[#allocation35_spill]] }
 0x3a9   : > { %s1775_s0 = sld [smem:[#allocation36_spill]]  ;;  %s1778_s22 = smov %s1344_s23 }
 0x3aa   : > { %s1776_s26 = sld [smem:[#allocation37_spill]]  ;;  %s1779_s23 = smov %s1348_s24 }
 0x3ab   : > { %s1777_s27 = sld [smem:[#allocation38_spill]]  ;;  %31 = sbr.rel (!%p29_p8) target bundleno = 16 (0x10), region = 190 }
 0x3ad   : > { %s1780_s24 = smov %s1773_s29 }
 0x3b0   :  { %786 = vsyncpa [#allocation14], 1 }
 0x3b1   :  { %788 = vsyncpa [#allocation14 + $0x1], 1 }
 0x3b2   :  { %789 = vsyncpa [#allocation17], 1 }
 0x3b3   :  { %791 = vsyncpa [#allocation17 + $0x1], 1 }
 0x3b4   :  { %792 = vsyncpa [#allocation15], 1 }
 0x3b5   :  { %794 = vsyncpa [#allocation15 + $0x1], 1 }
 0x3b6   :  { %795 = vsyncmov [#allocation4] }
 0x3b9   :  { %s796_s11 = vpop.sfrf %795 }
 0x3ba   :  { %p947_p10 = scmp.ne.s32.totalorder %s796_s11, 0 }
 0x3bc   :  { %800 = shalt.err (%p947_p10)  }
 0x3bd   :  { %802 = vsyncmov [#allocation4 + $0x1] }
 0x3c0   :  { %s803_s13 = vpop.sfrf %802 }
 0x3c1   :  { %p948_p11 = scmp.ne.s32.totalorder %s803_s13, 0 }
 0x3c3   :  { %807 = shalt.err (%p948_p11)  }
 0x3c4   :  { %809 = vsyncmov [#allocation4 + $0x2] }
 0x3c7   :  { %s810_s19 = vpop.sfrf %809 }
 0x3c8   :  { %p949_p6 = scmp.ne.s32.totalorder %s810_s19, 0 }
 0x3ca   :  { %814 = shalt.err (%p949_p6)  }
 0x3cb   :  { %816 = vsyncmov [#allocation4 + $0x3] }
 0x3ce   :  { %s817_s28 = vpop.sfrf %816 }
 0x3cf   :  { %p950_p9 = scmp.ne.s32.totalorder %s817_s28, 0 }
 0x3d1   :  { %821 = shalt.err (%p950_p9)  }

</bundles_post_ra>
